<compile_context>
chip_gen: v7x
topology: tpu7x:2x2x1
jax: 0.10.0
libtpu: 0.0.40
codegen_flags: <defaults>
</compile_context>

<pallas_src>
import functools

import jax
import jax.numpy as jnp
from jax.experimental import pallas as pl
from jax.experimental.pallas import tpu as pltpu


def _conv_bn_relu_kernel(p_ref, w_ref, g_ref, b_ref, o_ref, *, eps, true_count):
    # p_ref: (K, L)     im2col patches, K = Cin*KH*KW, L = pad128(N*Ho*Wo), lane-dense
    # w_ref: (Cout, K)  reshaped conv weight
    # g_ref: (Cout, 1)  BN gamma
    # b_ref: (Cout, 1)  BN beta
    # o_ref: (Cout, L)  conv+BN+ReLU output (padding columns are garbage, sliced off
    #                   by the wrapper)

    # --- Convolution: a single MXU contraction over K = Cin*KH*KW taps, batch
    #     concatenated along the 128-lane axis, accumulated in f32.
    acc = jnp.dot(w_ref[...], p_ref[...], preferred_element_type=jnp.float32)  # (Cout, L)

    # --- BatchNorm2d (training mode): per-channel batch statistics over the TRUE
    #     N*Ho*Wo elements.  Padded lane columns are exactly zero in `acc` (zero
    #     patch columns), so they contribute nothing to the mean; the variance uses
    #     the numerically stable two-pass form with a lane mask to exclude them.
    cnt = jnp.float32(true_count)
    mean = acc.sum(axis=1, keepdims=True) / cnt                       # (Cout, 1)

    col = jax.lax.broadcasted_iota(jnp.int32, acc.shape, 1)
    d = jnp.where(col < true_count, acc - mean, 0.0)
    var = (d * d).sum(axis=1, keepdims=True) / cnt                    # biased batch var
    inv = jax.lax.rsqrt(var + eps)                                    # EUP (free slot)
    scale = g_ref[...] * inv                                          # (Cout, 1)
    shift = b_ref[...] - mean * scale                                 # (Cout, 1)

    # --- Fused affine + ReLU epilogue; one pass, lane-dense unmasked stores.
    y = jnp.maximum(acc * scale + shift, 0.0)
    if y.dtype != o_ref.dtype:
        y = y.astype(o_ref.dtype)
    o_ref[...] = y


def conv_bn_relu(x_nchw, w_oihw, gamma, beta, *, stride=1, padding=0, eps=1e-5):
    """Pallas implementation of _ConvBNReLU.forward (training-mode BN)."""
    N, Cin, H, W = x_nchw.shape
    Cout, _, KH, KW = w_oihw.shape

    x = x_nchw
    if padding > 0:
        x = jnp.pad(x, ((0, 0), (0, 0), (padding, padding), (padding, padding)))
    Hp, Wp = H + 2 * padding, W + 2 * padding
    Ho = (Hp - KH) // stride + 1
    Wo = (Wp - KW) // stride + 1
    P = Ho * Wo
    K = Cin * KH * KW
    NP = N * P
    L = max(128, ((NP + 127) // 128) * 128)   # lane-pad to a multiple of 128

    # im2col (wrapper-side layout plumbing, handled by XLA).  Tap ordering is
    # (c, kh, kw) so it matches w_oihw.reshape(Cout, Cin*KH*KW).
    taps = []
    for kh in range(KH):
        for kw in range(KW):
            taps.append(
                jax.lax.slice(
                    x,
                    (0, 0, kh, kw),
                    (N, Cin, kh + (Ho - 1) * stride + 1, kw + (Wo - 1) * stride + 1),
                    (1, 1, stride, stride),
                )
            )
    patches = jnp.stack(taps, axis=2).reshape(N, K, P)       # (N, Cin*KH*KW, Ho*Wo)
    patches = patches.transpose(1, 0, 2).reshape(K, NP)      # (K, N*P), batch in lanes
    if L > NP:
        patches = jnp.pad(patches, ((0, 0), (0, L - NP)))    # zero lane padding

    w2d = w_oihw.reshape(Cout, K)
    g2 = gamma.reshape(Cout, 1).astype(jnp.float32)
    b2 = beta.reshape(Cout, 1).astype(jnp.float32)

    out_dtype = x_nchw.dtype
    cost = pl.CostEstimate(
        flops=2 * Cout * K * L + 6 * Cout * L,
        transcendentals=Cout,
        bytes_accessed=(
            patches.size * patches.dtype.itemsize
            + w2d.size * w2d.dtype.itemsize
            + (g2.size + b2.size) * 4
            + Cout * L * jnp.dtype(out_dtype).itemsize
        ),
    )

    kernel = functools.partial(_conv_bn_relu_kernel, eps=eps, true_count=NP)
    out = pl.pallas_call(
        kernel,
        out_shape=jax.ShapeDtypeStruct((Cout, L), out_dtype),
        in_specs=[pl.BlockSpec(memory_space=pltpu.MemorySpace.VMEM)] * 4,
        out_specs=pl.BlockSpec(memory_space=pltpu.MemorySpace.VMEM),
        cost_estimate=cost,
    )(patches, w2d, g2, b2)

    # Drop lane padding and restore NCHW (tiny wrapper-side transpose).
    out = out[:, :NP].reshape(Cout, N, P).transpose(1, 0, 2)
    return out.reshape(N, Cout, Ho, Wo)


def _reference(x_nchw, w_oihw, gamma, beta, *, stride=1, padding=0, eps=1e-5):
    """Pure-JAX reference matching PyTorch Conv2d + BatchNorm2d(train) + ReLU."""
    y = jax.lax.conv_general_dilated(
        x_nchw.astype(jnp.float32),
        w_oihw.astype(jnp.float32),
        window_strides=(stride, stride),
        padding=[(padding, padding), (padding, padding)],
        dimension_numbers=("NCHW", "OIHW", "NCHW"),
    )
    mean = jnp.mean(y, axis=(0, 2, 3), keepdims=True)
    var = jnp.mean((y - mean) ** 2, axis=(0, 2, 3), keepdims=True)
    y = (y - mean) * jax.lax.rsqrt(var + eps)
    y = y * gamma.reshape(1, -1, 1, 1) + beta.reshape(1, -1, 1, 1)
    return jnp.maximum(y, 0.0).astype(x_nchw.dtype)


if __name__ == "__main__":
    # Module config: _ConvBNReLU(in_channels=4, out_channels=8), defaults
    # kernel_size=3, stride=1, padding=0.
    N, Cin, H, W = 2, 4, 16, 16
    Cout, KH, KW = 8, 3, 3
    stride, padding = 1, 0

    key = jax.random.PRNGKey(0)
    kx, kw, kg, kb = jax.random.split(key, 4)

    x = jax.random.normal(kx, (N, Cin, H, W), dtype=jnp.float32)
    w = jax.random.normal(kw, (Cout, Cin, KH, KW), dtype=jnp.float32) * 0.1
    gamma = 1.0 + 0.1 * jax.random.normal(kg, (Cout,), dtype=jnp.float32)
    beta = 0.1 * jax.random.normal(kb, (Cout,), dtype=jnp.float32)

    out = conv_bn_relu(x, w, gamma, beta, stride=stride, padding=padding)
    out = jax.block_until_ready(out)

    ref = _reference(x, w, gamma, beta, stride=stride, padding=padding)
    assert out.shape == (N, Cout, (H - KH) // stride + 1, (W - KW) // stride + 1)
    assert jnp.allclose(out, ref, rtol=1e-4, atol=1e-4), "mismatch vs reference"

    print("KERNEL_OK")
</pallas_src>

<mosaic_0001>
module attributes {stable_mosaic.version = 11 : i64} {
  func.func @_conv_bn_relu_kernel(%arg0: memref<36x512xf32, #tpu.memory_space<vmem>>, %arg1: memref<8x36xf32, #tpu.memory_space<vmem>>, %arg2: memref<8x1xf32, #tpu.memory_space<vmem>>, %arg3: memref<8x1xf32, #tpu.memory_space<vmem>>, %arg4: memref<8x512xf32, #tpu.memory_space<vmem>>) attributes {dimension_semantics = [], scalar_prefetch = 0 : i64, scratch_operands = 0 : i64, tpu.core_type = #tpu.core_type<tc>} {
    %c0 = arith.constant 0 : index
    %c0_0 = arith.constant 0 : index
    %0 = vector.load %arg1[%c0, %c0_0] : memref<8x36xf32, #tpu.memory_space<vmem>>, vector<8x36xf32>
    %c0_1 = arith.constant 0 : index
    %c0_2 = arith.constant 0 : index
    %1 = vector.load %arg0[%c0_1, %c0_2] : memref<36x512xf32, #tpu.memory_space<vmem>>, vector<36x512xf32>
    %cst = arith.constant dense<0.000000e+00> : vector<8x512xf32>
    %2 = tpu.matmul %0, %1, %cst {dimension_numbers = #tpu.dot_dimension_numbers<[1], [0], [0], [1], [0, 0, 1, 1], [], []>} : vector<8x36xf32>, vector<36x512xf32>, vector<8x512xf32> -> vector<8x512xf32>
    %cst_3 = arith.constant dense<0.000000e+00> : vector<8xf32>
    %3 = vector.multi_reduction <add>, %2, %cst_3 [1] : vector<8x512xf32> to vector<8xf32>
    %4 = vector.shape_cast %3 : vector<8xf32> to vector<8x1xf32>
    %cst_4 = arith.constant 3.920000e+02 : f32
    %5 = vector.broadcast %cst_4 : f32 to vector<8x1xf32>
    %6 = arith.divf %4, %5 : vector<8x1xf32>
    %7 = tpu.iota {dimensions = array<i32: 1>} : vector<8x512xi32>
    %c392_i32 = arith.constant 392 : i32
    %8 = vector.broadcast %c392_i32 : i32 to vector<8x512xi32>
    %9 = arith.cmpi slt, %7, %8 : vector<8x512xi32>
    %10 = vector.broadcast %6 : vector<8x1xf32> to vector<8x512xf32>
    %11 = arith.subf %2, %10 : vector<8x512xf32>
    %cst_5 = arith.constant 0.000000e+00 : f32
    %12 = vector.broadcast %cst_5 : f32 to vector<8x512xf32>
    %13 = arith.select %9, %11, %12 : vector<8x512xi1>, vector<8x512xf32>
    %14 = arith.mulf %13, %13 : vector<8x512xf32>
    %cst_6 = arith.constant dense<0.000000e+00> : vector<8xf32>
    %15 = vector.multi_reduction <add>, %14, %cst_6 [1] : vector<8x512xf32> to vector<8xf32>
    %16 = vector.shape_cast %15 : vector<8xf32> to vector<8x1xf32>
    %cst_7 = arith.constant 3.920000e+02 : f32
    %17 = vector.broadcast %cst_7 : f32 to vector<8x1xf32>
    %18 = arith.divf %16, %17 : vector<8x1xf32>
    %cst_8 = arith.constant 9.99999974E-6 : f32
    %19 = vector.broadcast %cst_8 : f32 to vector<8x1xf32>
    %20 = arith.addf %18, %19 : vector<8x1xf32>
    %21 = math.rsqrt %20 : vector<8x1xf32>
    %c0_9 = arith.constant 0 : index
    %c0_10 = arith.constant 0 : index
    %22 = vector.load %arg2[%c0_9, %c0_10] : memref<8x1xf32, #tpu.memory_space<vmem>>, vector<8x1xf32>
    %23 = arith.mulf %22, %21 : vector<8x1xf32>
    %c0_11 = arith.constant 0 : index
    %c0_12 = arith.constant 0 : index
    %24 = vector.load %arg3[%c0_11, %c0_12] : memref<8x1xf32, #tpu.memory_space<vmem>>, vector<8x1xf32>
    %25 = arith.mulf %6, %23 : vector<8x1xf32>
    %26 = arith.subf %24, %25 : vector<8x1xf32>
    %27 = vector.broadcast %23 : vector<8x1xf32> to vector<8x512xf32>
    %28 = arith.mulf %2, %27 : vector<8x512xf32>
    %29 = vector.broadcast %26 : vector<8x1xf32> to vector<8x512xf32>
    %30 = arith.addf %28, %29 : vector<8x512xf32>
    %cst_13 = arith.constant 0.000000e+00 : f32
    %31 = vector.broadcast %cst_13 : f32 to vector<8x512xf32>
    %32 = arith.maximumf %30, %31 : vector<8x512xf32>
    %c0_14 = arith.constant 0 : index
    %c0_15 = arith.constant 0 : index
    %33 = vector.load %arg4[%c0_14, %c0_15] : memref<8x512xf32, #tpu.memory_space<vmem>>, vector<8x512xf32>
    tpu.vector_store %arg4[%c0_14, %c0_15], %32 {strides = array<i32>} : memref<8x512xf32, #tpu.memory_space<vmem>>, vector<8x512xf32>,
    return
  }
}

</mosaic_0001>

<bundles_post_ra>
// kernel: tpu_custom_call.1
= control target key start
LH: loop header
LB: loop body
LE: loop exit
PB: predicated region body
PF: predicated region fallthrough
CT: control target
= control target key end

     0   :  { %9 = vsyncpa [#allocation3], 0  ;;  %s438_s0 = inlined_call_operand.hbm [shape: f32[36,512], index: 0, kind: input, shape index: {}]   ;;  %s439_s1 = inlined_call_operand.vmem [shape: f32[8,36], index: 1, kind: input, shape index: {}]   ;;  %s440_s2 = inlined_call_operand.vmem [shape: f32[8,1], index: 2, kind: input, shape index: {}]   ;;  %s441_s3 = inlined_call_operand.vmem [shape: f32[8,1], index: 3, kind: input, shape index: {}]   ;;  %s442_s4 = inlined_call_operand.hbm [shape: f32[8,512], index: 4, kind: output, shape index: {}]  }
   0x1   :  { %10 = vsyncpa [#allocation4], 0  ;;  %s374_s15 = smov [#allocation2]   ;;  %s326_s19 = scalar_lea.hbm %s438_s0, 2560 }
   0x2   :  { %s16_s16 = sshll.u32 %s374_s15, 4  ;;  %p327_p0 = scmp.ne.s32.totalorder %s438_s0, %s326_s19  ;;  %s17_s16 = int_to_ptr.vmem [resolvable:$true] %s16_s16 }
   0x3   :  { %p330_p1 = scmp.lt.u32.totalorder %s326_s19, %s438_s0 }
   0x5   :  { %p332_p2 = pnand %p330_p1, %p327_p0 }
   0x7   :  { %335 = shalt.err (!%p332_p2)
}
   0x8   :  { %s336_s24 = scalar_lea.vmem %s17_s16, 2560  ;;  %p341_p4 = scmp.lt.s32.totalorder %s17_s16, %s17_s16 }
   0x9   :  { %p337_p3 = scmp.ne.s32.totalorder %s17_s16, %s336_s24  ;;  %p342_p5 = scmp.lt.s32.totalorder %s336_s24, %s336_s24 }
   0xb   :  { %p343_p6 = por %p342_p5, %p341_p4 }
   0xd   :  { %p344_p7 = pnand %p343_p6, %p337_p3 }
   0xf   :  { %347 = shalt.err (!%p344_p7)
}
  0x10   :  { %s375_s25 = smov 512   ;;  %s376_s26 = smov 32  }
  0x11   :  { %22 = dma.hbm_to_vmem [thread:$0]  %s438_s0, 2560, %s17_s16, [#allocation3], %s375_s25, %s375_s25, %s376_s26  }
  0x12   :  { %370 = dma.done.wait [#allocation3], 2560  }
  0x13   :  { %371 = vsyncadd [#allocation3], 4294964736  ;;  %v377_v0 = vmov 0.0   ;;  %v34_v1 = vld [vmem:[#allocation2 + $0x8] sm:$0xff]  ;;  %v33_v3 = vld [vmem:[#allocation2] sm:$0xff]  ;;  %vm57_vm0 = vcmask 1043456   ;;  %v219_v37 = vlaneseq }
  0x14   :  { %134 = vmatprep.mubr.f32.mxu0 %v377_v0  ;;  %205 = vmatprep.mubr.f32.mxu1 %v377_v0  ;;  %v38_v2 = vld [vmem:[#allocation2 + $0x28] sm:$0xff]  ;;  %v37_v5 = vld [vmem:[#allocation2 + $0x20] sm:$0xff]  ;;  %v36_v6 = vld [vmem:[#allocation2 + $0x18] sm:$0xff]  ;;  %vm53_vm1 = vcmask 293888   ;;  %v378_v54 = vmov 0   ;;  %s379_s7 = smov [#allocation5]  }
  0x15   :  { %v300_v4 = vpack.c.bf16 %v38_v2, %v34_v1  ;;  %v40_v7 = vld [vmem:[#allocation2 + $0x38] sm:$0xff]  ;;  %v302_v8 = vpack.c.bf16 %v37_v5, %v33_v3  ;;  %v35_v10 = vld [vmem:[#allocation2 + $0x10] sm:$0xff]  ;;  %v42_v12 = vld [vmem:[#allocation2 + $0x48] sm:$0xff]  ;;  %v220_v38 = vand.u32 127, %v219_v37  ;;  %322 = vset.pattern.permute.xlu1 %v378_v54  ;;  %323 = vset.pattern.permute.xlu0 %v378_v54  ;;  %s285_s8 = sshll.u32 %s379_s7, 4  ;;  %s286_s8 = int_to_ptr.vmem [resolvable:$true] %s285_s8 }
  0x16   :  { %v308_v9 = vpack.c.bf16 %v40_v7, %v36_v6  ;;  %v39_v11 = vld [vmem:[#allocation2 + $0x30] sm:$0xff]  ;;  %v46_v14 = vld [vmem:[#allocation2 + $0x68] sm:$0xff]  ;;  %v41_v15 = vld [vmem:[#allocation2 + $0x40] sm:$0xff]  ;;  %p353_p9 = scmp.lt.s32.totalorder %s286_s8, %s286_s8 }
  0x17   :  { %301 = vmatprep.subr.bf16.mxu0 %v300_v4  ;;  %v310_v13 = vpack.c.bf16 %v39_v11, %v35_v10  ;;  %v45_v16 = vld [vmem:[#allocation2 + $0x60] sm:$0xff]  ;;  %v304_v17 = vpack.c.bf16 %v46_v14, %v42_v12  ;;  %v44_v19 = vld [vmem:[#allocation2 + $0x58] sm:$0xff]  ;;  %v43_v21 = vld [vmem:[#allocation2 + $0x50] sm:$0xff]  ;;  %v223_v39 = vadd.s32 384, %v220_v38 }
  0x18   :  { %303 = vmatpush1.bf16.msra.mxu0 %v302_v8  ;;  %309 = vmatprep.subr.bf16.mxu1 %v308_v9  ;;  %v306_v18 = vpack.c.bf16 %v45_v16, %v41_v15  ;;  %v48_v20 = vld [vmem:[#allocation2 + $0x78] sm:$0xff]  ;;  %v47_v23 = vld [vmem:[#allocation2 + $0x70] sm:$0xff]  ;;  %v50_v25 = vld [vmem:[#allocation2 + $0x88] sm:$0xf] }
  0x19   :  { %311 = vmatpush1.bf16.msra.mxu1 %v310_v13  ;;  %v312_v22 = vpack.c.bf16 %v48_v20, %v44_v19  ;;  %305 = vmatprep.subr.bf16.mxu0 %v304_v17  ;;  %v314_v24 = vpack.c.bf16 %v47_v23, %v43_v21  ;;  %v52_v26 = vld [vmem:[#allocation2 + $0x98] sm:$0xf]  ;;  %v49_v27 = vld [vmem:[#allocation2 + $0x80] sm:$0xf]  ;;  %v51_v29 = vld [vmem:[#allocation2 + $0x90] sm:$0xf] }
  0x1a   :  { %v32_v28 = vld [vmem:[%s439_s1] sm:$0xff]  ;;  %vm227_vm2 = vcmp.lt.s32.totalorder %v223_v39, 392 }
  0x1b   :  { %313 = vmatprep.subr.bf16.mxu1 %v312_v22  ;;  %v248_v58 = vld [vmem:[%s440_s2] sm:$0xff]  ;;  %s348_s2 = scalar_lea.vmem %s286_s8, 512 }
  0x1c   :  { %307 = vmatpush1.bf16.msra.mxu0 %v306_v18  ;;  %v250_v61 = vld [vmem:[%s441_s3] sm:$0xff]  ;;  %p349_p8 = scmp.ne.s32.totalorder %s286_s8, %s348_s2  ;;  %p354_p10 = scmp.lt.s32.totalorder %s348_s2, %s348_s2 }
  0x1d   :  { %315 = vmatpush1.bf16.msra.mxu1 %v314_v24  ;;  %294 = vmatprep.subr.msk.mxu0 %vm57_vm0, %v50_v25 }
  0x1e   :  { %297 = vmatprep.subr.msk.mxu1 %vm57_vm0, %v52_v26  ;;  %p355_p11 = por %p354_p10, %p353_p9 }
  0x20   :  { %295 = vmatpush1.msk.msra.mxu0 %vm57_vm0, %v49_v27  ;;  %p356_p12 = pnand %p355_p11, %p349_p8 }
  0x21   :  { %296 = vmatmul.mubr.msk.f32.vlgmr.msra.gmra.mrb[0].mxu0 %vm53_vm1, %v32_v28  ;;  %298 = vmatpush1.msk.msra.mxu1 %vm57_vm0, %v51_v29 }
  0x22   :  { %299 = vmatmul.mubr.msk.f32.vlgmr.msra.gmra.mrb[0].mxu1 %vm53_vm1, %v32_v28 }
  0xf4   :  { %v136_v30 = vpop.f32.mrb[0].mxu0 }
  0xf5   :  { %v138_v31 = vpop.f32.mrb[1].mxu0  ;;  %v207_v32 = vpop.f32.mrb[0].mxu1 }
  0xf6   :  { %v212_v33 = vadd.f32 %v138_v31, %v136_v30  ;;  %v209_v34 = vpop.f32.mrb[1].mxu1 }
  0xf8   :  { %v213_v35 = vadd.f32 %v212_v33, %v207_v32 }
  0xfa   :  { %v214_v36 = vadd.f32 %v213_v35, %v209_v34 }
  0xfc   :  { %215 = vadd.xlane.f32.xlu0 %v214_v36 }
 0x189   :  { %v216_v40 = vpop.xlane.xlu0 %215 }
 0x18a   :  { %v218_v41 = vmul.f32 0.0025510204, %v216_v40 }
 0x18c   :  { %v228_v42 = vsub.f32 %v136_v30, %v218_v41  ;;  %v229_v43 = vsub.f32 %v138_v31, %v218_v41  ;;  %v230_v44 = vsub.f32 %v207_v32, %v218_v41  ;;  %v231_v45 = vsub.f32 %v209_v34, %v218_v41 }
 0x18e   :  { %v236_v46 = vmul.f32 %v228_v42, %v228_v42  ;;  %v237_v47 = vmul.f32 %v229_v43, %v229_v43  ;;  %v235_v48 = vsel %vm227_vm2, %v231_v45, 0.0  ;;  %v238_v49 = vmul.f32 %v230_v44, %v230_v44 }
 0x18f   :  { %v239_v51 = vmul.f32 %v235_v48, %v235_v48 }
 0x190   :  { %v240_v50 = vadd.f32 %v237_v47, %v236_v46 }
 0x192   :  { %v241_v52 = vadd.f32 %v240_v50, %v238_v49 }
 0x194   :  { %v242_v53 = vadd.f32 %v241_v52, %v239_v51 }
 0x196   :  { %243 = vadd.xlane.f32.xlu0 %v242_v53 }
 0x223   :  { %v244_v55 = vpop.xlane.xlu0 %243 }
 0x224   :  { %v245_v56 = vmul.f32 0.0025510204, %v244_v55 }
 0x226   :  { %v246_v57 = vadd.f32 1e-05, %v245_v56 }
 0x228   :  { %324 = vrsqrt.f32 %v246_v57 }
 0x232   :  { %v325_v59 = vpop.eup %324 }
 0x233   :  { %v249_v60 = vmul.f32 %v325_v59, %v248_v58 }
 0x235   :  { %255 = vperm.xlu1 %322, %v249_v60   ;;  %v251_v62 = vmul.f32 %v249_v60, %v218_v41 }
 0x237   :  { %v252_v63 = vsub.f32 %v250_v61, %v251_v62 }
 0x239   :  { %264 = vperm.xlu1 %322, %v252_v63  }
 0x2b4   :  { %v256_v0 = vpop.permute.xlu1 %255 }
 0x2b5   :  { %v258_v1 = vmul.f32 %v256_v0, %v136_v30  ;;  %v259_v2 = vmul.f32 %v256_v0, %v138_v31  ;;  %v260_v3 = vmul.f32 %v256_v0, %v207_v32  ;;  %v261_v4 = vmul.f32 %v256_v0, %v209_v34 }
 0x2b8   :  { %v265_v5 = vpop.permute.xlu1 %264 }
 0x2b9   :  { %v267_v6 = vadd.f32 %v265_v5, %v258_v1  ;;  %v268_v7 = vadd.f32 %v265_v5, %v259_v2  ;;  %v269_v8 = vadd.f32 %v265_v5, %v260_v3  ;;  %v270_v9 = vadd.f32 %v265_v5, %v261_v4 }
 0x2bb   :  { %v271_v10 = vmax.f32 %v267_v6, 0.0  ;;  %v272_v11 = vmax.f32 %v268_v7, 0.0  ;;  %v273_v12 = vmax.f32 %v269_v8, 0.0  ;;  %v274_v13 = vmax.f32 %v270_v9, 0.0 }
 0x2bd   :  { %275 = vst [vmem:[#allocation5] sm:$0xff] %v271_v10  ;;  %276 = vst [vmem:[#allocation5 + $0x8] sm:$0xff] %v272_v11 }
 0x2be   :  { %277 = vst [vmem:[#allocation5 + $0x10] sm:$0xff] %v273_v12  ;;  %278 = vst [vmem:[#allocation5 + $0x18] sm:$0xff] %v274_v13 }
 0x2bf   :  { %359 = shalt.err (!%p356_p12)
}
 0x2c0   :  { %s360_s10 = scalar_lea.hbm %s442_s4, 512 }
 0x2c1   :  { %p361_p13 = scmp.ne.s32.totalorder %s442_s4, %s360_s10  ;;  %p364_p0 = scmp.lt.u32.totalorder %s360_s10, %s442_s4 }
 0x2c3   :  { %p366_p1 = pnand %p364_p0, %p361_p13 }
 0x2c5   :  { %369 = shalt.err (!%p366_p1)
}
 0x2c6   :  { %288 = dma.vmem_to_hbm [thread:$0]  %s286_s8, 512, %s442_s4, [#allocation4]  }
 0x2c7   :  { %372 = dma.done.wait [#allocation4], 512  }
 0x2c8   :  { %373 = vsyncadd [#allocation4], 4294966784 }
 0x2c9   :  { %292 = vsyncpa [#allocation3], 1 }
 0x2ca   :  { %293 = vsyncpa [#allocation4], 1 }

</bundles_post_ra>
